<compile_context>
chip_gen: v7x
topology: tpu7x:2x2x1
jax: 0.10.0
libtpu: 0.0.40
codegen_flags: <defaults>
</compile_context>

<pallas_src>
import jax
import jax.numpy as jnp
from jax.experimental import pallas as pl
from jax.experimental.pallas import tpu as pltpu


# ----------------------------------------------------------------------------
# helpers
# ----------------------------------------------------------------------------
_KEY = jax.random.PRNGKey(0)
_counter = [0]


def _next_key():
    _counter[0] += 1
    return jax.random.fold_in(_KEY, _counter[0])


def _round_up(x, m):
    return ((x + m - 1) // m) * m


def _pad_mid(mid):
    """Pad intermediate channel count toward a multiple of 128 when cheap."""
    m128 = _round_up(mid, 128)
    if mid <= 128 or m128 <= int(mid * 1.3):
        return m128
    return _round_up(mid, 8)


def _choose_m_tile(m, max_tile=512):
    """Pick (tile, padded_total): tile % 8 == 0 and tile | padded_total."""
    mp = _round_up(m, 8)
    if mp <= max_tile:
        return mp, mp
    t = max_tile - (max_tile % 8)
    while t >= 8:
        if mp % t == 0:
            break
        t -= 8
    if t >= 128:
        return t, mp
    return max_tile, _round_up(m, max_tile)


_VMEM_CAP = [None]


def _vmem_cap():
    if _VMEM_CAP[0] is None:
        try:
            _VMEM_CAP[0] = int(pltpu.get_tpu_info().vmem_capacity_bytes)
        except Exception:
            _VMEM_CAP[0] = 64 * 1024 * 1024      # conservative (v7x per-TC)
    return _VMEM_CAP[0]


def _vmem_limit(block_bytes):
    need = 2 * int(sum(block_bytes)) + (6 << 20)   # double-buffer + slack
    cap = max(32 * 1024 * 1024, (_vmem_cap() * 3) // 4)
    return int(min(cap, max(32 * 1024 * 1024, need)))


def _ds(start, size, stride):
    if stride == 1 or size == 1:
        return pl.ds(start, size)
    return pl.ds(start, size, stride=stride)


# ----------------------------------------------------------------------------
# deterministic parameter init (weights bf16, affines packed f32)
# ----------------------------------------------------------------------------
def init_bn(c):
    k1, k2, k3 = jax.random.split(_next_key(), 3)
    gamma = 1.0 + 0.1 * jax.random.normal(k1, (c,), jnp.float32)
    beta = 0.02 * jax.random.normal(k2, (c,), jnp.float32)
    mean = 0.02 * jax.random.normal(k3, (c,), jnp.float32)
    var = jnp.ones((c,), jnp.float32)
    scale = gamma / jnp.sqrt(var + 1e-5)
    shift = beta - mean * scale
    return scale, shift


def _pack_affine(width, s1, b1, s2=None, b2=None):
    """Rows [scale1, shift1, scale2, shift2, 0...]; padded channels get 0."""
    a = jnp.zeros((8, width), jnp.float32)
    a = a.at[0, : s1.shape[0]].set(s1)
    a = a.at[1, : b1.shape[0]].set(b1)
    if s2 is not None:
        a = a.at[2, : s2.shape[0]].set(s2)
        a = a.at[3, : b2.shape[0]].set(b2)
    return a


def init_split_conv(in_c, out_c, ksize, intermed=True, post=None,
                    use_im2col=False):
    kt, kh, kw = ksize
    if intermed:
        full = kt * kh * kw * in_c * out_c
        split = kh * kw * in_c + kt * out_c
        mid = max(1, full // split)
    else:
        mid = in_c
    mid_p = _pad_mid(mid)
    taps = kh * kw

    # spatial conv weight: (taps, in_c, mid_p), tap-major / channel-minor
    w = jax.random.normal(_next_key(), (taps, in_c, mid), jnp.float32)
    w = w * (2.0 / (taps * in_c)) ** 0.5
    w_sp = jnp.zeros((taps, in_c, mid_p), jnp.float32).at[:, :, :mid].set(w)
    w_sp = w_sp.astype(jnp.bfloat16)
    s_sp, b_sp = init_bn(mid)
    aff_sp = _pack_affine(mid_p, s_sp, b_sp)          # padded channels -> 0

    # temporal conv weight: (kt, mid_p, out_c); padded mid rows are zero
    wt = jax.random.normal(_next_key(), (kt, mid, out_c), jnp.float32)
    wt = wt * (2.0 / (kt * mid)) ** 0.5
    w_t = jnp.zeros((kt, mid_p, out_c), jnp.float32).at[:, :mid, :].set(wt)
    w_t = w_t.astype(jnp.bfloat16)
    s_t, b_t = init_bn(out_c)
    if post is not None:
        aff_t = _pack_affine(out_c, s_t, b_t, post[0], post[1])
    else:
        aff_t = _pack_affine(out_c, s_t, b_t)

    return {'ksize': ksize, 'mid_p': mid_p, 'use_im2col': use_im2col,
            'w_sp': w_sp, 'aff_sp': aff_sp,
            'w_t': w_t, 'aff_t': aff_t,
            'has_post': post is not None}


# ----------------------------------------------------------------------------
# Pallas kernel: fused matmul (relu(bn(x @ w)))  -- stem conv1 im2col path
# ----------------------------------------------------------------------------
def _matmul_bn_relu_kernel(x_ref, w_ref, aff_ref, o_ref):
    y = jnp.dot(x_ref[...], w_ref[...], preferred_element_type=jnp.float32)
    aff = aff_ref[...]
    y = y * aff[0:1, :] + aff[1:2, :]                 # folded BatchNorm
    y = jnp.maximum(y, 0.0)                           # ReLU
    o_ref[...] = y.astype(o_ref.dtype)


def matmul_bn_relu(patches, w, aff):
    M, K = patches.shape
    K2, Np = w.shape
    assert K == K2
    tm, Mp = _choose_m_tile(M)
    if Mp != M:
        patches = jnp.pad(patches, ((0, Mp - M), (0, 0)))
    blk = [tm * K * 2, K * Np * 2, 8 * Np * 4, tm * Np * 2]
    out = pl.pallas_call(
        _matmul_bn_relu_kernel,
        out_shape=jax.ShapeDtypeStruct((Mp, Np), jnp.bfloat16),
        grid_spec=pltpu.PrefetchScalarGridSpec(
            num_scalar_prefetch=0,
            grid=(Mp // tm,),
            in_specs=[
                pl.BlockSpec((tm, K), lambda i: (i, 0)),
                pl.BlockSpec((K, Np), lambda i: (0, 0)),
                pl.BlockSpec((8, Np), lambda i: (0, 0)),
            ],
            out_specs=pl.BlockSpec((tm, Np), lambda i: (i, 0)),
        ),
        compiler_params=pltpu.CompilerParams(
            dimension_semantics=("parallel",),
            vmem_limit_bytes=_vmem_limit(blk),
        ),
    )(patches, w, aff)
    return out[:M] if Mp != M else out


def _im2col_2d(x, kh, kw, sh, sw, ph, pw):
    """x: (NT, H, W, C) -> (NT*Ho*Wo, kh*kw*C) tap-major / channel-minor."""
    NT, H, W, C = x.shape
    xp = jnp.pad(x, ((0, 0), (ph, ph), (pw, pw), (0, 0)))
    Ho = (H + 2 * ph - kh) // sh + 1
    Wo = (W + 2 * pw - kw) // sw + 1
    cols = []
    for dh in range(kh):
        for dw in range(kw):
            cols.append(xp[:, dh:dh + (Ho - 1) * sh + 1:sh,
                           dw:dw + (Wo - 1) * sw + 1:sw, :])
    p = jnp.stack(cols, axis=3)                # (NT, Ho, Wo, taps, C)
    return p.reshape(NT * Ho * Wo, kh * kw * C), Ho, Wo


# ----------------------------------------------------------------------------
# Pallas kernel: frame-resident direct spatial conv (no HBM im2col)
# ----------------------------------------------------------------------------
def _make_spatial_direct_kernel(kh, kw, sh, sw, ph, pw, H, W, Ho, Wo, has_pad):
    def compute(src, w_ref, aff_ref, o_ref, acc_ref):
        acc_ref[...] = jnp.zeros_like(acc_ref)
        for dh in range(kh):
            for dw in range(kw):
                patch = src[_ds(dh, Ho, sh), _ds(dw, Wo, sw), :]
                patch = patch.reshape(Ho * Wo, patch.shape[-1])
                acc_ref[...] += jnp.dot(patch, w_ref[dh * kw + dw],
                                        preferred_element_type=jnp.float32)
        aff = aff_ref[...]
        y = acc_ref[...] * aff[0:1, :] + aff[1:2, :]   # folded BatchNorm
        y = jnp.maximum(y, 0.0)                        # ReLU
        o_ref[...] = y.astype(o_ref.dtype)

    if has_pad:
        def kernel(x_ref, w_ref, aff_ref, o_ref, acc_ref, xp_ref):
            # build the zero-padded halo in VMEM (no HBM pad copy)
            xp_ref[...] = jnp.zeros_like(xp_ref)
            xp_ref[ph:ph + H, pw:pw + W, :] = x_ref[...]
            compute(xp_ref, w_ref, aff_ref, o_ref, acc_ref)
    else:
        def kernel(x_ref, w_ref, aff_ref, o_ref, acc_ref):
            compute(x_ref, w_ref, aff_ref, o_ref, acc_ref)
    return kernel


def spatial_conv_direct(x, w, aff, ksz, strd, pad):
    """x: (N, T, H, W, Cin) -> (N, T, Ho*Wo, mid_p), fused BN+ReLU."""
    N, T, H, W, Cin = x.shape
    kh, kw = ksz
    sh, sw = strd
    ph, pw = pad
    taps, Cin2, midp = w.shape
    assert Cin == Cin2 and taps == kh * kw
    Ho = (H + 2 * ph - kh) // sh + 1
    Wo = (W + 2 * pw - kw) // sw + 1
    Hp, Wp = H + 2 * ph, W + 2 * pw
    M = Ho * Wo
    NT = N * T
    has_pad = (ph > 0 or pw > 0)
    x4 = x.reshape(NT, H, W, Cin)

    scratch = [pltpu.VMEM((M, midp), jnp.float32)]
    if has_pad:
        scratch.append(pltpu.VMEM((Hp, Wp, Cin), jnp.bfloat16))

    blk = [H * W * Cin * 2, taps * Cin * midp * 2, 8 * midp * 4,
           M * midp * 2, M * midp * 4, Hp * Wp * Cin * 2]

    out = pl.pallas_call(
        _make_spatial_direct_kernel(kh, kw, sh, sw, ph, pw, H, W, Ho, Wo,
                                    has_pad),
        out_shape=jax.ShapeDtypeStruct((NT, M, midp), jnp.bfloat16),
        grid_spec=pltpu.PrefetchScalarGridSpec(
            num_scalar_prefetch=0,
            grid=(NT,),
            in_specs=[
                pl.BlockSpec((None, H, W, Cin), lambda b: (b, 0, 0, 0)),
                pl.BlockSpec((taps, Cin, midp), lambda b: (0, 0, 0)),
                pl.BlockSpec((8, midp), lambda b: (0, 0)),
            ],
            out_specs=pl.BlockSpec((None, M, midp), lambda b: (b, 0, 0)),
            scratch_shapes=scratch,
        ),
        compiler_params=pltpu.CompilerParams(
            dimension_semantics=("parallel",),
            vmem_limit_bytes=_vmem_limit(blk),
        ),
    )(x4, w, aff)
    return out.reshape(N, T, M, midp), Ho, Wo


# ----------------------------------------------------------------------------
# Pallas kernel: temporal (kt,1,1) conv, kt taps fused into one grid step
# ----------------------------------------------------------------------------
def _make_temporal_kernel(kt, st, pt, T, To, has_aff2, has_res, final_relu):
    def kernel(*refs):
        xs = refs[:kt]
        w_ref = refs[kt]
        aff_ref = refs[kt + 1]
        pos = kt + 2
        res_ref = None
        if has_res:
            res_ref = refs[pos]
            pos += 1
        o_ref = refs[pos]
        acc_ref = refs[pos + 1]

        acc_ref[...] = jnp.zeros_like(acc_ref)
        to = pl.program_id(0) % To
        for k in range(kt):
            def _acc(k=k):
                acc_ref[...] += jnp.dot(xs[k][...], w_ref[k],
                                        preferred_element_type=jnp.float32)
            if pt == 0:
                _acc()
            else:
                t_in = to * st + k - pt
                pl.when(jnp.logical_and(t_in >= 0, t_in <= T - 1))(_acc)

        aff = aff_ref[...]
        y = acc_ref[...] * aff[0:1, :] + aff[1:2, :]   # this conv's BN
        y = jnp.maximum(y, 0.0)                        # ReLU
        if has_aff2:
            y = y * aff[2:3, :] + aff[3:4, :]          # outer res-block BN
        if has_res:
            y = y + res_ref[...].astype(jnp.float32)
        if final_relu:
            y = jnp.maximum(y, 0.0)
        o_ref[...] = y.astype(o_ref.dtype)

    return kernel


def temporal_conv(xm, w_t, aff_t, st, pt,
                  residual=None, has_aff2=False, final_relu=False):
    """xm: (N, T, HW, Cin) -> (N, To, HW, Co)."""
    N, T, HW, Ci = xm.shape
    kt, Ci2, Co = w_t.shape
    assert Ci == Ci2
    To = (T + 2 * pt - kt) // st + 1
    has_res = residual is not None

    def x_map(k):
        def m(b, k=k):
            n = b // To
            t = (b % To) * st + k - pt
            t = jnp.minimum(jnp.maximum(t, 0), T - 1)   # clamp, masked in-kernel
            return (n, t, 0, 0)
        return m

    in_specs = [pl.BlockSpec((None, None, HW, Ci), x_map(k)) for k in range(kt)]
    inputs = [xm] * kt
    in_specs += [pl.BlockSpec((kt, Ci, Co), lambda b: (0, 0, 0)),
                 pl.BlockSpec((8, Co), lambda b: (0, 0))]
    inputs += [w_t, aff_t]
    if has_res:
        in_specs.append(pl.BlockSpec((None, None, HW, Co),
                                     lambda b: (b // To, b % To, 0, 0)))
        inputs.append(residual)

    blk = [kt * HW * Ci * 2, kt * Ci * Co * 2, 8 * Co * 4,
           HW * Co * 2, HW * Co * 4] + ([HW * Co * 2] if has_res else [])

    out = pl.pallas_call(
        _make_temporal_kernel(kt, st, pt, T, To, has_aff2, has_res, final_relu),
        out_shape=jax.ShapeDtypeStruct((N, To, HW, Co), jnp.bfloat16),
        grid_spec=pltpu.PrefetchScalarGridSpec(
            num_scalar_prefetch=0,
            grid=(N * To,),
            in_specs=in_specs,
            out_specs=pl.BlockSpec((None, None, HW, Co),
                                   lambda b: (b // To, b % To, 0, 0)),
            scratch_shapes=[pltpu.VMEM((HW, Co), jnp.float32)],
        ),
        compiler_params=pltpu.CompilerParams(
            dimension_semantics=("parallel",),
            vmem_limit_bytes=_vmem_limit(blk),
        ),
    )(*inputs)
    return out


# ----------------------------------------------------------------------------
# Pallas kernel: global average pool (AdaptiveAvgPool3d(1))
# ----------------------------------------------------------------------------
def _pool_kernel(x_ref, o_ref):
    o_ref[...] = jnp.sum(x_ref[...].astype(jnp.float32), axis=0, keepdims=True)


def global_avg_pool(x):
    """(N, T, H, W, C) -> (N, C) mean over T*H*W."""
    N, T, H, W, C = x.shape
    L = T * H * W
    xr = x.reshape(N, L, C)
    out = pl.pallas_call(
        _pool_kernel,
        out_shape=jax.ShapeDtypeStruct((N, 1, C), jnp.float32),
        grid_spec=pltpu.PrefetchScalarGridSpec(
            num_scalar_prefetch=0,
            grid=(N,),
            in_specs=[pl.BlockSpec((None, L, C), lambda i: (i, 0, 0))],
            out_specs=pl.BlockSpec((None, 1, C), lambda i: (i, 0, 0)),
        ),
        compiler_params=pltpu.CompilerParams(
            dimension_semantics=("parallel",),
            vmem_limit_bytes=_vmem_limit([L * C * 2, C * 4]),
        ),
    )(xr)
    return out.reshape(N, C) * (1.0 / float(L))


# ----------------------------------------------------------------------------
# SplitSpatioTemporalConv: spatial 1xkxk conv->BN->ReLU, temporal kx1x1
# conv->BN->ReLU, with optional fused outer BN / residual / final ReLU
# ----------------------------------------------------------------------------
def split_conv_forward(x, p, stride, padding, residual=None, final_relu=False):
    kt, kh, kw = p['ksize']
    st, sh, sw = stride
    pt, ph, pw = padding
    N, T, H, W, Cin = x.shape

    if p['use_im2col']:
        x4 = x.reshape(N * T, H, W, Cin)
        patches, Ho, Wo = _im2col_2d(x4, kh, kw, sh, sw, ph, pw)
        w2 = p['w_sp'].reshape(kh * kw * Cin, p['mid_p'])
        y = matmul_bn_relu(patches, w2, p['aff_sp'])
        xm = y.reshape(N, T, Ho * Wo, p['mid_p'])
    else:
        xm, Ho, Wo = spatial_conv_direct(x, p['w_sp'], p['aff_sp'],
                                         (kh, kw), (sh, sw), (ph, pw))

    res = None
    if residual is not None:
        rN, rT, rH, rW, rC = residual.shape
        res = residual.reshape(rN, rT, rH * rW, rC)

    out = temporal_conv(xm, p['w_t'], p['aff_t'], st, pt,
                        residual=res, has_aff2=p['has_post'],
                        final_relu=final_relu)
    N2, To, _, Co = out.shape
    return out.reshape(N2, To, Ho, Wo, Co)


# ----------------------------------------------------------------------------
# Res block / res layer (standard R(2+1)D reference structure)
# ----------------------------------------------------------------------------
def init_res_block(in_c, out_c, ksize, downsample, intermed):
    bn1 = init_bn(out_c)
    bn2 = init_bn(out_c)
    p = {'downsample': downsample, 'ksize': ksize,
         'conv1': init_split_conv(in_c, out_c, (ksize,) * 3, intermed, post=bn1),
         'conv2': init_split_conv(out_c, out_c, (ksize,) * 3, intermed, post=bn2)}
    if downsample:
        dbn = init_bn(out_c)
        p['dconv'] = init_split_conv(in_c, out_c, (1, 1, 1), intermed, post=dbn)
    return p


def res_block_forward(x, p):
    pad = p['ksize'] // 2
    ds = p['downsample']
    res = split_conv_forward(x, p['conv1'],
                             (2, 2, 2) if ds else (1, 1, 1), (pad,) * 3,
                             final_relu=True)
    if ds:
        shortcut = split_conv_forward(x, p['dconv'], (2, 2, 2), (0, 0, 0),
                                      final_relu=False)
    else:
        shortcut = x
    return split_conv_forward(res, p['conv2'], (1, 1, 1), (pad,) * 3,
                              residual=shortcut, final_relu=True)


def init_res_layer(in_c, out_c, ksize, layer_size, downsample, intermed):
    blocks = [init_res_block(in_c, out_c, ksize, downsample, intermed)]
    for _ in range(layer_size - 1):
        blocks.append(init_res_block(out_c, out_c, ksize, False, intermed))
    return blocks


def res_layer_forward(x, blocks):
    for b in blocks:
        x = res_block_forward(x, b)
    return x


# ----------------------------------------------------------------------------
# R2Plus1DNet
# ----------------------------------------------------------------------------
def init_r2plus1d(layer_sizes, intermed_channels=True):
    return {
        'conv1': init_split_conv(3, 64, (3, 7, 7), intermed_channels,
                                 use_im2col=True),
        'conv2': init_res_layer(64, 64, 3, layer_sizes[0], False, intermed_channels),
        'conv3': init_res_layer(64, 128, 3, layer_sizes[1], True, intermed_channels),
        'conv4': init_res_layer(128, 256, 3, layer_sizes[2], True, intermed_channels),
        'conv5': init_res_layer(256, 512, 3, layer_sizes[3], True, intermed_channels),
    }


def r2plus1d_forward(x_ncdhw, params):
    # PyTorch NCDHW -> channels-last NDHWC, bf16 activations throughout.
    x = jnp.transpose(x_ncdhw, (0, 2, 3, 4, 1)).astype(jnp.bfloat16)
    x = split_conv_forward(x, params['conv1'], (1, 2, 2), (1, 3, 3),
                           final_relu=False)
    x = res_layer_forward(x, params['conv2'])
    x = res_layer_forward(x, params['conv3'])
    x = res_layer_forward(x, params['conv4'])
    x = res_layer_forward(x, params['conv5'])
    return global_avg_pool(x)          # (N, 512) == pool(...).view(-1, 512)


# ----------------------------------------------------------------------------
if __name__ == "__main__":
    layer_sizes = [1, 1, 1, 1]
    params = init_r2plus1d(layer_sizes, intermed_channels=True)

    # small deterministic video clip: (N=2, C=3, T=8, H=16, W=16)
    x = jax.random.normal(jax.random.PRNGKey(0), (2, 3, 8, 16, 16), jnp.float32)

    out = r2plus1d_forward(x, params)
    out = jax.block_until_ready(out)

    assert out.shape == (2, 512), out.shape
    assert bool(jnp.all(jnp.isfinite(out)))
    print("KERNEL_OK")
</pallas_src>

<mosaic_0001>
module attributes {stable_mosaic.version = 11 : i64} {
  func.func @_matmul_bn_relu_kernel(%arg0: i32, %arg1: memref<512x147xbf16, #tpu.memory_space<vmem>>, %arg2: memref<147x128xbf16, #tpu.memory_space<vmem>>, %arg3: memref<8x128xf32, #tpu.memory_space<vmem>>, %arg4: memref<512x128xbf16, #tpu.memory_space<vmem>>) attributes {dimension_semantics = [#tpu.dimension_semantics<parallel>], iteration_bounds = array<i64: 2>, scalar_prefetch = 0 : i64, scratch_operands = 0 : i64, tpu.core_type = #tpu.core_type<tc>, window_params = [{transform_indices = @transform_0, window_bounds = array<i64: 512, 147>}, {pipeline_mode = #tpu.pipeline_mode<synchronous>, transform_indices = @transform_1, window_bounds = array<i64: 147, 128>}, {pipeline_mode = #tpu.pipeline_mode<synchronous>, transform_indices = @transform_2, window_bounds = array<i64: 8, 128>}, {transform_indices = @transform_3, window_bounds = array<i64: 512, 128>}]} {
    %c0 = arith.constant 0 : index
    %c0_0 = arith.constant 0 : index
    %0 = vector.load %arg1[%c0, %c0_0] : memref<512x147xbf16, #tpu.memory_space<vmem>>, vector<512x147xbf16>
    %c0_1 = arith.constant 0 : index
    %c0_2 = arith.constant 0 : index
    %1 = vector.load %arg2[%c0_1, %c0_2] : memref<147x128xbf16, #tpu.memory_space<vmem>>, vector<147x128xbf16>
    %cst = arith.constant dense<0.000000e+00> : vector<512x128xf32>
    %2 = tpu.matmul %0, %1, %cst {dimension_numbers = #tpu.dot_dimension_numbers<[1], [0], [0], [1], [0, 0, 1, 1], [], []>} : vector<512x147xbf16>, vector<147x128xbf16>, vector<512x128xf32> -> vector<512x128xf32>
    %c0_3 = arith.constant 0 : index
    %c0_4 = arith.constant 0 : index
    %3 = vector.load %arg3[%c0_3, %c0_4] : memref<8x128xf32, #tpu.memory_space<vmem>>, vector<8x128xf32>
    %4 = vector.extract_strided_slice %3 {offsets = [0, 0], sizes = [1, 128], strides = [1, 1]} : vector<8x128xf32> to vector<1x128xf32>
    %5 = vector.broadcast %4 : vector<1x128xf32> to vector<512x128xf32>
    %6 = arith.mulf %2, %5 : vector<512x128xf32>
    %7 = vector.extract_strided_slice %3 {offsets = [1, 0], sizes = [1, 128], strides = [1, 1]} : vector<8x128xf32> to vector<1x128xf32>
    %8 = vector.broadcast %7 : vector<1x128xf32> to vector<512x128xf32>
    %9 = arith.addf %6, %8 : vector<512x128xf32>
    %cst_5 = arith.constant 0.000000e+00 : f32
    %10 = vector.broadcast %cst_5 : f32 to vector<512x128xf32>
    %11 = arith.maximumf %9, %10 : vector<512x128xf32>
    %12 = arith.truncf %11 : vector<512x128xf32> to vector<512x128xbf16>
    %c0_6 = arith.constant 0 : index
    %c0_7 = arith.constant 0 : index
    %13 = vector.load %arg4[%c0_6, %c0_7] : memref<512x128xbf16, #tpu.memory_space<vmem>>, vector<512x128xbf16>
    tpu.vector_store %arg4[%c0_6, %c0_7], %12 {strides = array<i32>} : memref<512x128xbf16, #tpu.memory_space<vmem>>, vector<512x128xbf16>,
    return
  }
  func.func @transform_0(%arg0: i32) -> (i32, i32) {
    %c0_i32 = arith.constant 0 : i32
    %c0_i32_0 = arith.constant 0 : i32
    return %arg0, %c0_i32 : i32, i32
  }
  func.func @transform_1(%arg0: i32) -> (i32, i32) {
    %c0_i32 = arith.constant 0 : i32
    %c0_i32_0 = arith.constant 0 : i32
    %c0_i32_1 = arith.constant 0 : i32
    return %c0_i32, %c0_i32_0 : i32, i32
  }
  func.func @transform_2(%arg0: i32) -> (i32, i32) {
    %c0_i32 = arith.constant 0 : i32
    %c0_i32_0 = arith.constant 0 : i32
    %c0_i32_1 = arith.constant 0 : i32
    return %c0_i32, %c0_i32_0 : i32, i32
  }
  func.func @transform_3(%arg0: i32) -> (i32, i32) {
    %c0_i32 = arith.constant 0 : i32
    %c0_i32_0 = arith.constant 0 : i32
    return %arg0, %c0_i32 : i32, i32
  }
}

</mosaic_0001>

<bundles_post_ra>
// kernel: tpu_custom_call.1
= control target key start
LH: loop header
LB: loop body
LE: loop exit
PB: predicated region body
PF: predicated region fallthrough
CT: control target
= control target key end

     0   :  { %8 = vsyncpa [#allocation3], 0  ;;  %s2696_s0 = inlined_call_operand.vmem [shape: bf16[1024,147], index: 0, kind: input, shape index: {}]   ;;  %s2697_s1 = inlined_call_operand.vmem [shape: bf16[147,128], index: 1, kind: input, shape index: {}]   ;;  %s2698_s2 = inlined_call_operand.vmem [shape: f32[8,128], index: 2, kind: input, shape index: {}]   ;;  %s2699_s3 = inlined_call_operand.hbm [shape: bf16[1024,128], index: 3, kind: output, shape index: {}]  }
   0x1   :  { %10 = vsyncpa [#allocation3 + $0x1], 0  ;;  %s2292_s12 = smov 0   ;;  %s2294_s13 = smov 0  }
   0x2   :  { %s2296_s14 = smov 0   ;;  %s2298_s15 = smov 0  }
   0x3 LB: > { %s2313_s16 = sadd.s32 4294967295, %s2265_s15   ;;  %s1594_s17 = sadd.s32 4294967294, %s2265_s15   ;;  %s2265_s15 = sphi %s2298_s15, %s2705_s15   ;;  %s2261_s14 = sphi %s2296_s14, %s2704_s14   ;;  %s2257_s13 = sphi %s2294_s13, %s2703_s13   ;;  %s2253_s12 = sphi %s2292_s12, %s2702_s12  }
   0x4   : > { %s2317_s18 = sadd.s32 1, %s2265_s15   ;;  %s91_s19 = sadd.s32 1, %s2261_s14 }
   0x5   : > { %s88_s20 = ssub.s32 %s2265_s15, %s2317_s18  ;;  %p101_p0 = scmp.ne.s32.totalorder %s2261_s14, %s2257_s13 }
   0x6   : > { %p89_p1 = scmp.eq.s32.totalorder %s88_s20, 0  ;;  %p102_p2 = scmp.eq.s32.totalorder %s2313_s16, 1 }
   0x7   : > { %p107_p3 = scmp.ne.s32.totalorder %s2257_s13, %s2253_s12  ;;  %p108_p4 = scmp.eq.s32.totalorder %s1594_s17, 1 }
   0x8   : > { %s2328_s21 = scalar_select %p89_p1, %s2261_s14, %s91_s19  }
   0x9   : > { %p2330_p5 = por %p102_p2, %p101_p0  ;;  %p2334_p6 = por %p108_p4, %p107_p3 }
   0xa   : > { %p1597_p7 = scmp.ge.s32.totalorder %s2265_s15, 1  ;;  %p142_p8 = scmp.lt.s32.totalorder %s2265_s15, 3 }
   0xc   : > { %p143_p9 = pnand %p1597_p7, %p142_p8 }
   0xd   : > { %v2097_v0 = vld [vmem:[%s2697_s1] sm:$0xff] (!%p143_p9)   ;;  %v2267_v1 = vmov (!%p143_p9), 0   ;;  %v2098_v2 = vld [vmem:[%s2697_s1 + $0x8] sm:$0xff] (!%p143_p9)   ;;  %v2099_v3 = vld [vmem:[%s2697_s1 + $0x10] sm:$0xff] (!%p143_p9)   ;;  %s1599_s30 = sshll.u32 (!%p143_p9), %s2313_s16, 6  ;;  %vm604_vm0 = vcmask (!%p143_p9), 154624  }
   0xe   : > { %146 = sbr.rel (%p143_p9) target bundleno = 412 (0x19c), region = 32  ;;  %708 = vmatprep.subr.bf16.mxu0 (!%p143_p9), %v2267_v1  ;;  %2034 = vmatprep.subr.bf16.mxu1 (!%p143_p9), %v2267_v1  ;;  %p168_p10 = scmp.lt.s32.totalorder (!%p143_p9), %s1599_s30, 127  ;;  %v2100_v4 = vld [vmem:[%s2697_s1 + $0x18] sm:$0xff] (!%p143_p9)   ;;  %v2101_v5 = vld [vmem:[%s2697_s1 + $0x20] sm:$0xff] (!%p143_p9)   ;;  %v2102_v8 = vld [vmem:[%s2697_s1 + $0x28] sm:$0xff] (!%p143_p9)   ;;  %vm701_vm1 = vcmask (!%p143_p9), 1040384  }
   0xf   : > { %709 = vmatpush1.bf16.msra.mxu0 (!%p143_p9), %v2097_v0  ;;  %2044 = vmatpush1.bf16.msra.mxu1 (!%p143_p9), %v2097_v0  ;;  %v2103_v9 = vld [vmem:[%s2697_s1 + $0x30] sm:$0xff] (!%p143_p9)   ;;  %v2104_v10 = vld [vmem:[%s2697_s1 + $0x38] sm:$0xff] (!%p143_p9)   ;;  %vm702_vm2 = vcmask (!%p143_p9), 1041408   ;;  %v2268_v11 = vmov (!%p143_p9), 65535   ;;  %v2105_v13 = vld [vmem:[%s2697_s1 + $0x40] sm:$0xff] (!%p143_p9)   ;;  %s2269_s24 = smov (!%p143_p9), [#allocation2]  }
  0x10   : > { %710 = vmatprep.subr.bf16.mxu0 (!%p143_p9), %v2267_v1  ;;  %2035 = vmatprep.subr.bf16.mxu1 (!%p143_p9), %v2267_v1  ;;  %v703_v12 = vsel (!%p143_p9), %vm701_vm1, 4294967295, %v2268_v11  ;;  %v2106_v14 = vld [vmem:[%s2697_s1 + $0x48] ss:$0 sps:$4 sm:$0x33] (!%p143_p9)   ;;  %s2207_s25 = sshll.u32 (!%p143_p9), %s2269_s24, 4  ;;  %s2208_s25 = int_to_ptr.vmem [resolvable:$false] %s2207_s25 }
  0x11   : > { %v704_v15 = vsel (!%p143_p9), %vm702_vm2, %v703_v12, 0  ;;  %s2209_s26 = scalar_lea.vmem (!%p143_p9), %s2208_s25, 8192 }
  0x12   : > { %v706_v16 = vand.u32 (!%p143_p9), %v2106_v14, %v704_v15  ;;  %v998_v15 = vlaneseq (!%p143_p9) }
  0x13   : > { %711 = vmatpush1.bf16.msra.mxu0 (!%p143_p9), %v2098_v2  ;;  %2045 = vmatpush1.bf16.msra.mxu1 (!%p143_p9), %v2098_v2 }
  0x14   : > { %712 = vmatprep.subr.bf16.mxu0 (!%p143_p9), %v2267_v1  ;;  %2036 = vmatprep.subr.bf16.mxu1 (!%p143_p9), %v2267_v1 }
  0x15   : > { %s2707_s30 = smov (!%p168_p10, %s1599_s30), 127 }
  0x16   : > { %s1777_s6 = sshll.u32 %s2707_s30, 3 }
  0x17   : > { %713 = vmatpush1.bf16.msra.mxu0 %v2099_v3  ;;  %2046 = vmatpush1.bf16.msra.mxu1 %v2099_v3  ;;  %s2356_s9 = scalar_lea.vmem %s2696_s0, %s1777_s6  ;;  %s164_s6 = sand.u32 1, %s2257_s13  }
  0x18   : > { %714 = vmatprep.subr.bf16.mxu0 %v2267_v1  ;;  %2037 = vmatprep.subr.bf16.mxu1 %v2267_v1  ;;  %v2109_v6 = vld [vmem:[%s2356_s9 + $0x4] ss:$8 sps:$4 sm:$0xff]   ;;  %v2107_v17 = vld [vmem:[%s2356_s9] ss:$8 sps:$4 sm:$0xff]   ;;  %v2113_v19 = vld [vmem:[%s2356_s9 + $0x14] ss:$8 sps:$4 sm:$0xff]  }
  0x19   : > { %v2112_v7 = vld [vmem:[%s2356_s9 + $0x104] ss:$8 sps:$4 sm:$0xff]   ;;  %1676 = vmatprep.mubr.msk.bf16.mxu0 %vm604_vm0, %v2109_v6  ;;  %v2110_v18 = vld [vmem:[%s2356_s9 + $0x100] ss:$8 sps:$4 sm:$0xff]   ;;  %v2115_v20 = vld [vmem:[%s2356_s9 + $0x114] ss:$8 sps:$4 sm:$0xff]  }
  0x1a   : > { %1692 = vmatprep.mubr.msk.bf16.mxu1 %vm604_vm0, %v2112_v7  ;;  %v2117_v21 = vld [vmem:[%s2356_s9 + $0x10] ss:$8 sps:$4 sm:$0xff]   ;;  %v2119_v23 = vld [vmem:[%s2356_s9 + $0x24] ss:$8 sps:$4 sm:$0xff]   ;;  %v2123_v25 = vld [vmem:[%s2356_s9 + $0x20] ss:$8 sps:$4 sm:$0xff]  }
  0x1b   : > { %715 = vmatpush1.bf16.msra.mxu0 %v2100_v4  ;;  %2047 = vmatpush1.bf16.msra.mxu1 %v2100_v4  ;;  %v2118_v22 = vld [vmem:[%s2356_s9 + $0x110] ss:$8 sps:$4 sm:$0xff]   ;;  %v2121_v24 = vld [vmem:[%s2356_s9 + $0x124] ss:$8 sps:$4 sm:$0xff]   ;;  %v2124_v26 = vld [vmem:[%s2356_s9 + $0x120] ss:$8 sps:$4 sm:$0xff]  }
  0x1c   : > { %716 = vmatprep.subr.bf16.mxu0 %v2267_v1  ;;  %2038 = vmatprep.subr.bf16.mxu1 %v2267_v1  ;;  %v2125_v27 = vld [vmem:[%s2356_s9 + $0x34] ss:$8 sps:$4 sm:$0xff]   ;;  %v2129_v29 = vld [vmem:[%s2356_s9 + $0x30] ss:$8 sps:$4 sm:$0xff]   ;;  %v2131_v31 = vld [vmem:[%s2356_s9 + $0x44] ss:$8 sps:$4 sm:$0xff]  }
  0x1d   : > { %v2127_v28 = vld [vmem:[%s2356_s9 + $0x134] ss:$8 sps:$4 sm:$0xff]   ;;  %v2130_v30 = vld [vmem:[%s2356_s9 + $0x130] ss:$8 sps:$4 sm:$0xff]   ;;  %v2133_v32 = vld [vmem:[%s2356_s9 + $0x144] ss:$8 sps:$4 sm:$0xff]  }
  0x1e   : > { %v2135_v33 = vld [vmem:[%s2356_s9 + $0x40] ss:$8 sps:$4 sm:$0xff]   ;;  %v2137_v35 = vld [vmem:[%s2356_s9 + $0x54] ss:$8 sps:$4 sm:$0xff]   ;;  %v2141_v37 = vld [vmem:[%s2356_s9 + $0x50] ss:$8 sps:$4 sm:$0xff]  }
  0x1f   : > { %717 = vmatpush1.bf16.msra.mxu0 %v2101_v5  ;;  %2048 = vmatpush1.bf16.msra.mxu1 %v2101_v5  ;;  %v2136_v34 = vld [vmem:[%s2356_s9 + $0x140] ss:$8 sps:$4 sm:$0xff]   ;;  %v2139_v36 = vld [vmem:[%s2356_s9 + $0x154] ss:$8 sps:$4 sm:$0xff]   ;;  %v2142_v38 = vld [vmem:[%s2356_s9 + $0x150] ss:$8 sps:$4 sm:$0xff]  }
  0x20   : > { %718 = vmatprep.subr.bf16.mxu0 %v2267_v1  ;;  %2039 = vmatprep.subr.bf16.mxu1 %v2267_v1  ;;  %v2143_v39 = vld [vmem:[%s2356_s9 + $0x64] ss:$8 sps:$4 sm:$0xff]   ;;  %v2147_v41 = vld [vmem:[%s2356_s9 + $0x60] ss:$8 sps:$4 sm:$0xff]   ;;  %v2149_v43 = vld [vmem:[%s2356_s9 + $0x74] ss:$8 sps:$4 sm:$0xff]  }
  0x21   : > { %v2145_v40 = vld [vmem:[%s2356_s9 + $0x164] ss:$8 sps:$4 sm:$0xff]   ;;  %v2148_v42 = vld [vmem:[%s2356_s9 + $0x160] ss:$8 sps:$4 sm:$0xff]   ;;  %v2151_v44 = vld [vmem:[%s2356_s9 + $0x174] ss:$8 sps:$4 sm:$0xff]  }
  0x22   : > { %v2153_v45 = vld [vmem:[%s2356_s9 + $0x70] ss:$8 sps:$4 sm:$0xff]   ;;  %v2155_v47 = vld [vmem:[%s2356_s9 + $0x84] ss:$8 sps:$4 sm:$0xff]   ;;  %v2159_v49 = vld [vmem:[%s2356_s9 + $0x80] ss:$8 sps:$4 sm:$0xff]  }
  0x23   : > { %719 = vmatpush1.bf16.msra.mxu0 %v2102_v8  ;;  %2049 = vmatpush1.bf16.msra.mxu1 %v2102_v8  ;;  %v2154_v46 = vld [vmem:[%s2356_s9 + $0x170] ss:$8 sps:$4 sm:$0xff]   ;;  %v2157_v48 = vld [vmem:[%s2356_s9 + $0x184] ss:$8 sps:$4 sm:$0xff]   ;;  %v2160_v50 = vld [vmem:[%s2356_s9 + $0x180] ss:$8 sps:$4 sm:$0xff]  }
  0x24   : > { %720 = vmatprep.subr.bf16.mxu0 %v2267_v1  ;;  %2040 = vmatprep.subr.bf16.mxu1 %v2267_v1  ;;  %v2161_v51 = vld [vmem:[%s2356_s9 + $0x94] ss:$8 sps:$4 sm:$0xff]   ;;  %v2165_v53 = vld [vmem:[%s2356_s9 + $0x90] ss:$8 sps:$4 sm:$0xff]   ;;  %v2167_v55 = vld [vmem:[%s2356_s9 + $0xa4] ss:$8 sps:$4 sm:$0xff]  }
  0x25   : > { %v2163_v52 = vld [vmem:[%s2356_s9 + $0x194] ss:$8 sps:$4 sm:$0xff]   ;;  %v2166_v54 = vld [vmem:[%s2356_s9 + $0x190] ss:$8 sps:$4 sm:$0xff]   ;;  %v2169_v56 = vld [vmem:[%s2356_s9 + $0x1a4] ss:$8 sps:$4 sm:$0xff]  }
  0x26   : > { %v2171_v57 = vld [vmem:[%s2356_s9 + $0xa0] ss:$8 sps:$4 sm:$0xff]   ;;  %v2173_v59 = vld [vmem:[%s2356_s9 + $0xb4] ss:$8 sps:$4 sm:$0xff]   ;;  %v2177_v61 = vld [vmem:[%s2356_s9 + $0xb0] ss:$8 sps:$4 sm:$0xff]  }
  0x27   : > { %721 = vmatpush1.bf16.msra.mxu0 %v2103_v9  ;;  %2050 = vmatpush1.bf16.msra.mxu1 %v2103_v9  ;;  %v2172_v58 = vld [vmem:[%s2356_s9 + $0x1a0] ss:$8 sps:$4 sm:$0xff]   ;;  %v2175_v60 = vld [vmem:[%s2356_s9 + $0x1b4] ss:$8 sps:$4 sm:$0xff]   ;;  %v2178_v62 = vld [vmem:[%s2356_s9 + $0x1b0] ss:$8 sps:$4 sm:$0xff]  }
  0x28   : > { %722 = vmatprep.subr.bf16.mxu0 %v2267_v1  ;;  %2041 = vmatprep.subr.bf16.mxu1 %v2267_v1  ;;  %v2179_v63 = vld [vmem:[%s2356_s9 + $0xc4] ss:$8 sps:$4 sm:$0xff]   ;;  %v2184_v2 = vld [vmem:[%s2356_s9 + $0x1c0] ss:$8 sps:$4 sm:$0xff]   ;;  %v2185_v3 = vld [vmem:[%s2356_s9 + $0xd4] ss:$8 sps:$4 sm:$0xff]  }
  0x29   : > { %v2181_v0 = vld [vmem:[%s2356_s9 + $0x1c4] ss:$8 sps:$4 sm:$0xff]   ;;  %v2187_v4 = vld [vmem:[%s2356_s9 + $0x1d4] ss:$8 sps:$4 sm:$0xff]   ;;  %v2189_v5 = vld [vmem:[%s2356_s9 + $0xd0] ss:$8 sps:$4 sm:$0xff]  }
  0x2a   : > { %v2190_v6 = vld [vmem:[%s2356_s9 + $0x1d0] ss:$8 sps:$4 sm:$0xff]   ;;  %v2191_v7 = vld [vmem:[%s2356_s9 + $0xe4] ss:$8 sps:$4 sm:$0xff]   ;;  %v2195_v9 = vld [vmem:[%s2356_s9 + $0xe0] ss:$8 sps:$4 sm:$0xff]  }
  0x2b   : > { %723 = vmatpush1.bf16.msra.mxu0 %v2104_v10  ;;  %2051 = vmatpush1.bf16.msra.mxu1 %v2104_v10  ;;  %v2193_v8 = vld [vmem:[%s2356_s9 + $0x1e4] ss:$8 sps:$4 sm:$0xff]   ;;  %v2196_v10 = vld [vmem:[%s2356_s9 + $0x1e0] ss:$8 sps:$4 sm:$0xff]   ;;  %v2197_v11 = vld [vmem:[%s2356_s9 + $0xf4] ss:$8 sps:$4 sm:$0xff]  }
  0x2c   : > { %724 = vmatprep.subr.bf16.mxu0 %v2267_v1  ;;  %2042 = vmatprep.subr.bf16.mxu1 %v2267_v1  ;;  %v2199_v12 = vld [vmem:[%s2356_s9 + $0x1f4] ss:$8 sps:$4 sm:$0xff]   ;;  %v2202_v14 = vld [vmem:[%s2356_s9 + $0x1f0] ss:$8 sps:$4 sm:$0xff]   ;;  %s1598_s7 = sshll.u32 %s164_s6, 8 }
  0x2d   : > { %s2492_s8 = scalar_lea.vmem [#allocation2], %s1598_s7 }
  0x2e   : > { %s1532_s10 = sshll.u32 %s2492_s8, 4  ;;  %s2649_s10 = int_to_ptr.vmem [resolvable:$true] %s1532_s10 }
  0x2f   : > { %725 = vmatpush1.bf16.msra.mxu0 %v2105_v13  ;;  %2052 = vmatpush1.bf16.msra.mxu1 %v2105_v13  ;;  %v2201_v13 = vld [vmem:[%s2356_s9 + $0xf0] ss:$8 sps:$4 sm:$0xff]   ;;  %s2203_s20 = scalar_lea.vmem %s2649_s10, 4096  ;;  %p2210_p0 = scmp.lt.s32.totalorder %s2649_s10, %s2208_s25 }
  0x30   : > { %726 = vmatprep.subr.bf16.mxu0 %v2267_v1  ;;  %2043 = vmatprep.subr.bf16.mxu1 %v2267_v1  ;;  %v2183_v1 = vld [vmem:[%s2356_s9 + $0xc0] ss:$8 sps:$4 sm:$0xff]   ;;  %s1842_s9 = sshll.u32 %s2313_s16, 12  ;;  %s2655_s16 = scalar_lea.sflag [#allocation3], %s164_s6 }
  0x31   : > { %s2647_s19 = scalar_lea.hbm %s2699_s3, %s1842_s9  ;;  %p2204_p11 = scmp.ne.s32.totalorder %s2649_s10, %s2203_s20 }
  0x32   : > { %p2211_p1 = scmp.lt.s32.totalorder %s2209_s26, %s2203_s20 }
  0x33   : > { %727 = vmatpush1.bf16.msra.mxu0 %v706_v16  ;;  %2053 = vmatpush1.bf16.msra.mxu1 %v706_v16  ;;  %v999_v16 = vshrl.u32 %v998_v15, 7  ;;  %p2205_p12 = pnand %p2204_p11, %p2330_p5 }
  0x34   : > { %p2212_p2 = por %p2211_p1, %p2210_p0 }
  0x35   : > { %p2206_p13 = pneg %p2205_p12 }
  0x36   : > { %741 = vmatmul.mubr.bf16.vlgmr.msra.gmra.mrb[0].mxu0 %v2107_v17  ;;  %869 = vmatmul.mubr.bf16.vlgmr.msra.gmra.mrb[0].mxu1 %v2110_v18  ;;  %v1000_v17 = vsub.s32 0, %v999_v16  ;;  %v997_v18 = vld [vmem:[%s2698_s2] sm:$0xff] }
  0x37   : > { %1677 = vmatprep.mubr.msk.bf16.mxu0 %vm604_vm0, %v2113_v19  ;;  %1693 = vmatprep.mubr.msk.bf16.mxu1 %vm604_vm0, %v2115_v20  ;;  %v1068_v19 = vsub.s32 1, %v999_v16  ;;  %p2213_p3 = pnand %p2212_p2, %p2206_p13 }
  0x38   : > { %v2475_v20 = vrot.slane %v997_v18, %v1000_v17 }
  0x3e   : > { %749 = vmatmul.mubr.bf16.gmra.mrb[4].mxu0 %v2117_v21  ;;  %877 = vmatmul.mubr.bf16.gmra.mrb[4].mxu1 %v2118_v22  ;;  %v2477_v21 = vrot.slane %v997_v18, %v1068_v19 }
  0x3f   : > { %1678 = vmatprep.mubr.msk.bf16.mxu0 %vm604_vm0, %v2119_v23  ;;  %1694 = vmatprep.mubr.msk.bf16.mxu1 %vm604_vm0, %v2121_v24 }
  0x46   : > { %757 = vmatmul.mubr.bf16.gmra.mrb[8].mxu0 %v2123_v25  ;;  %885 = vmatmul.mubr.bf16.gmra.mrb[8].mxu1 %v2124_v26 }
  0x47   : > { %1679 = vmatprep.mubr.msk.bf16.mxu0 %vm604_vm0, %v2125_v27  ;;  %1695 = vmatprep.mubr.msk.bf16.mxu1 %vm604_vm0, %v2127_v28 }
  0x4e   : > { %765 = vmatmul.mubr.bf16.gmra.mrb[12].mxu0 %v2129_v29  ;;  %893 = vmatmul.mubr.bf16.gmra.mrb[12].mxu1 %v2130_v30 }
  0x4f   : > { %1680 = vmatprep.mubr.msk.bf16.mxu0 %vm604_vm0, %v2131_v31  ;;  %1696 = vmatprep.mubr.msk.bf16.mxu1 %vm604_vm0, %v2133_v32 }
  0x56   : > { %773 = vmatmul.mubr.bf16.gmra.mrb[16].mxu0 %v2135_v33  ;;  %901 = vmatmul.mubr.bf16.gmra.mrb[16].mxu1 %v2136_v34 }
  0x57   : > { %1681 = vmatprep.mubr.msk.bf16.mxu0 %vm604_vm0, %v2137_v35  ;;  %1697 = vmatprep.mubr.msk.bf16.mxu1 %vm604_vm0, %v2139_v36 }
  0x5e   : > { %781 = vmatmul.mubr.bf16.gmra.mrb[20].mxu0 %v2141_v37  ;;  %909 = vmatmul.mubr.bf16.gmra.mrb[20].mxu1 %v2142_v38 }
  0x5f   : > { %1682 = vmatprep.mubr.msk.bf16.mxu0 %vm604_vm0, %v2143_v39  ;;  %1698 = vmatprep.mubr.msk.bf16.mxu1 %vm604_vm0, %v2145_v40 }
  0x66   : > { %789 = vmatmul.mubr.bf16.gmra.mrb[24].mxu0 %v2147_v41  ;;  %917 = vmatmul.mubr.bf16.gmra.mrb[24].mxu1 %v2148_v42 }
  0x67   : > { %1683 = vmatprep.mubr.msk.bf16.mxu0 %vm604_vm0, %v2149_v43  ;;  %1699 = vmatprep.mubr.msk.bf16.mxu1 %vm604_vm0, %v2151_v44 }
  0x6e   : > { %797 = vmatmul.mubr.bf16.gmra.mrb[28].mxu0 %v2153_v45  ;;  %925 = vmatmul.mubr.bf16.gmra.mrb[28].mxu1 %v2154_v46 }
  0x6f   : > { %1684 = vmatprep.mubr.msk.bf16.mxu0 %vm604_vm0, %v2155_v47  ;;  %1700 = vmatprep.mubr.msk.bf16.mxu1 %vm604_vm0, %v2157_v48 }
  0x76   : > { %805 = vmatmul.mubr.bf16.gmra.mrb[32].mxu0 %v2159_v49  ;;  %933 = vmatmul.mubr.bf16.gmra.mrb[32].mxu1 %v2160_v50 }
  0x77   : > { %1685 = vmatprep.mubr.msk.bf16.mxu0 %vm604_vm0, %v2161_v51  ;;  %1701 = vmatprep.mubr.msk.bf16.mxu1 %vm604_vm0, %v2163_v52 }
  0x7e   : > { %813 = vmatmul.mubr.bf16.gmra.mrb[36].mxu0 %v2165_v53  ;;  %941 = vmatmul.mubr.bf16.gmra.mrb[36].mxu1 %v2166_v54 }
  0x7f   : > { %1686 = vmatprep.mubr.msk.bf16.mxu0 %vm604_vm0, %v2167_v55  ;;  %1702 = vmatprep.mubr.msk.bf16.mxu1 %vm604_vm0, %v2169_v56 }
  0x86   : > { %821 = vmatmul.mubr.bf16.gmra.mrb[40].mxu0 %v2171_v57  ;;  %949 = vmatmul.mubr.bf16.gmra.mrb[40].mxu1 %v2172_v58 }
  0x87   : > { %1687 = vmatprep.mubr.msk.bf16.mxu0 %vm604_vm0, %v2173_v59  ;;  %1703 = vmatprep.mubr.msk.bf16.mxu1 %vm604_vm0, %v2175_v60 }
  0x8e   : > { %829 = vmatmul.mubr.bf16.gmra.mrb[44].mxu0 %v2177_v61  ;;  %957 = vmatmul.mubr.bf16.gmra.mrb[44].mxu1 %v2178_v62 }
  0x8f   : > { %1688 = vmatprep.mubr.msk.bf16.mxu0 %vm604_vm0, %v2179_v63  ;;  %1704 = vmatprep.mubr.msk.bf16.mxu1 %vm604_vm0, %v2181_v0 }
  0x96   : > { %837 = vmatmul.mubr.bf16.gmra.mrb[48].mxu0 %v2183_v1  ;;  %965 = vmatmul.mubr.bf16.gmra.mrb[48].mxu1 %v2184_v2 }
  0x97   : > { %1689 = vmatprep.mubr.msk.bf16.mxu0 %vm604_vm0, %v2185_v3  ;;  %1705 = vmatprep.mubr.msk.bf16.mxu1 %vm604_vm0, %v2187_v4 }
  0x9e   : > { %845 = vmatmul.mubr.bf16.gmra.mrb[52].mxu0 %v2189_v5  ;;  %973 = vmatmul.mubr.bf16.gmra.mrb[52].mxu1 %v2190_v6 }
  0x9f   : > { %1690 = vmatprep.mubr.msk.bf16.mxu0 %vm604_vm0, %v2191_v7  ;;  %1706 = vmatprep.mubr.msk.bf16.mxu1 %vm604_vm0, %v2193_v8 }
  0xa6   : > { %853 = vmatmul.mubr.bf16.gmra.mrb[56].mxu0 %v2195_v9  ;;  %981 = vmatmul.mubr.bf16.gmra.mrb[56].mxu1 %v2196_v10 }
  0xa7   : > { %1691 = vmatprep.mubr.msk.bf16.mxu0 %vm604_vm0, %v2197_v11  ;;  %1707 = vmatprep.mubr.msk.bf16.mxu1 %vm604_vm0, %v2199_v12 }
  0xae   : > { %861 = vmatmul.mubr.bf16.gmra.mrb[60].mxu0 %v2201_v13  ;;  %989 = vmatmul.mubr.bf16.gmra.mrb[60].mxu1 %v2202_v14 }
 0x109   : > { %v742_v22 = vpop.f32.mrb[0].mxu0  ;;  %v870_v23 = vpop.f32.mrb[0].mxu1 }
 0x10a   : > { %v1002_v24 = vmul.f32 %v2475_v20, %v742_v22  ;;  %v1034_v25 = vmul.f32 %v2475_v20, %v870_v23  ;;  %v744_v26 = vpop.f32.mrb[1].mxu0  ;;  %v872_v27 = vpop.f32.mrb[1].mxu1 }
 0x10b   : > { %v745_v28 = vpop.f32.mrb[2].mxu0  ;;  %v873_v29 = vpop.f32.mrb[2].mxu1 }
 0x10c   : > { %v1070_v30 = vadd.f32 %v2477_v21, %v1002_v24  ;;  %v1102_v31 = vadd.f32 %v2477_v21, %v1034_v25  ;;  %v1003_v32 = vmul.f32 %v2475_v20, %v745_v28  ;;  %v1035_v33 = vmul.f32 %v2475_v20, %v873_v29  ;;  %v747_v34 = vpop.f32.mrb[3].mxu0  ;;  %v875_v35 = vpop.f32.mrb[3].mxu1 }
 0x10e   : > { %v1071_v36 = vadd.f32 %v2477_v21, %v1003_v32  ;;  %v1103_v37 = vadd.f32 %v2477_v21, %v1035_v33  ;;  %v1134_v38 = vmax.f32 %v1070_v30, 0.0  ;;  %v1166_v39 = vmax.f32 %v1102_v31, 0.0 }
 0x110   : > { %v1135_v40 = vmax.f32 %v1071_v36, 0.0  ;;  %v1167_v41 = vmax.f32 %v1103_v37, 0.0 }
 0x111   : > { %v750_v42 = vpop.f32.mrb[4].mxu0  ;;  %v878_v43 = vpop.f32.mrb[4].mxu1 }
 0x112   : > { %v1846_v44 = vpack.c.bf16 %v1135_v40, %v1134_v38  ;;  %v1926_v45 = vpack.c.bf16 %v1167_v41, %v1166_v39  ;;  %v1004_v46 = vmul.f32 %v2475_v20, %v750_v42  ;;  %v1036_v47 = vmul.f32 %v2475_v20, %v878_v43  ;;  %v752_v48 = vpop.f32.mrb[5].mxu0  ;;  %v880_v49 = vpop.f32.mrb[5].mxu1 }
 0x113   : > { %v753_v50 = vpop.f32.mrb[6].mxu0  ;;  %v881_v51 = vpop.f32.mrb[6].mxu1 }
 0x114   : > { %1847 = vst [vmem:[%s2492_s8] sm:$0xff] %v1846_v44   ;;  %2018 = vst [vmem:[%s2492_s8 + $0x80] sm:$0xff] %v1926_v45   ;;  %v1072_v52 = vadd.f32 %v2477_v21, %v1004_v46  ;;  %v1104_v53 = vadd.f32 %v2477_v21, %v1036_v47  ;;  %v1005_v54 = vmul.f32 %v2475_v20, %v753_v50  ;;  %v755_v56 = vpop.f32.mrb[7].mxu0  ;;  %v883_v57 = vpop.f32.mrb[7].mxu1 }
 0x115   : > { %v1037_v55 = vmul.f32 %v2475_v20, %v881_v51 }
 0x116   : > { %v1073_v58 = vadd.f32 %v2477_v21, %v1005_v54  ;;  %v1136_v60 = vmax.f32 %v1072_v52, 0.0  ;;  %v1168_v61 = vmax.f32 %v1104_v53, 0.0 }
 0x117   : > { %v1105_v59 = vadd.f32 %v2477_v21, %v1037_v55 }
 0x118   : > { %v1137_v62 = vmax.f32 %v1073_v58, 0.0 }
 0x119   : > { %v1169_v63 = vmax.f32 %v1105_v59, 0.0  ;;  %v758_v0 = vpop.f32.mrb[8].mxu0  ;;  %v886_v1 = vpop.f32.mrb[8].mxu1 }
 0x11a   : > { %v1851_v2 = vpack.c.bf16 %v1137_v62, %v1136_v60  ;;  %v1006_v4 = vmul.f32 %v2475_v20, %v758_v0  ;;  %v1038_v5 = vmul.f32 %v2475_v20, %v886_v1  ;;  %v760_v6 = vpop.f32.mrb[9].mxu0  ;;  %v888_v7 = vpop.f32.mrb[9].mxu1 }
 0x11b   : > { %v1931_v3 = vpack.c.bf16 %v1169_v63, %v1168_v61  ;;  %v761_v8 = vpop.f32.mrb[10].mxu0  ;;  %v889_v9 = vpop.f32.mrb[10].mxu1 }
 0x11c   : > { %2003 = vst [vmem:[%s2492_s8 + $0x8] sm:$0xff] %v1851_v2   ;;  %v1074_v10 = vadd.f32 %v2477_v21, %v1006_v4  ;;  %v1106_v11 = vadd.f32 %v2477_v21, %v1038_v5  ;;  %v1007_v12 = vmul.f32 %v2475_v20, %v761_v8  ;;  %v1039_v13 = vmul.f32 %v2475_v20, %v889_v9  ;;  %v763_v14 = vpop.f32.mrb[11].mxu0  ;;  %v891_v15 = vpop.f32.mrb[11].mxu1 }
 0x11d   : > { %2019 = vst [vmem:[%s2492_s8 + $0x88] sm:$0xff] %v1931_v3  }
 0x11e   : > { %v1075_v16 = vadd.f32 %v2477_v21, %v1007_v12  ;;  %v1107_v17 = vadd.f32 %v2477_v21, %v1039_v13  ;;  %v1138_v18 = vmax.f32 %v1074_v10, 0.0  ;;  %v1170_v19 = vmax.f32 %v1106_v11, 0.0 }
 0x120   : > { %v1139_v22 = vmax.f32 %v1075_v16, 0.0  ;;  %v1171_v23 = vmax.f32 %v1107_v17, 0.0 }
 0x121   : > { %v766_v24 = vpop.f32.mrb[12].mxu0  ;;  %v894_v25 = vpop.f32.mrb[12].mxu1 }
 0x122   : > { %v1856_v26 = vpack.c.bf16 %v1139_v22, %v1138_v18  ;;  %v1936_v27 = vpack.c.bf16 %v1171_v23, %v1170_v19  ;;  %v1008_v28 = vmul.f32 %v2475_v20, %v766_v24  ;;  %v1040_v29 = vmul.f32 %v2475_v20, %v894_v25  ;;  %v768_v30 = vpop.f32.mrb[13].mxu0  ;;  %v896_v31 = vpop.f32.mrb[13].mxu1 }
 0x123   : > { %v769_v32 = vpop.f32.mrb[14].mxu0  ;;  %v897_v33 = vpop.f32.mrb[14].mxu1 }
 0x124   : > { %2004 = vst [vmem:[%s2492_s8 + $0x10] sm:$0xff] %v1856_v26   ;;  %2020 = vst [vmem:[%s2492_s8 + $0x90] sm:$0xff] %v1936_v27   ;;  %v1076_v34 = vadd.f32 %v2477_v21, %v1008_v28  ;;  %v1108_v35 = vadd.f32 %v2477_v21, %v1040_v29  ;;  %v1009_v36 = vmul.f32 %v2475_v20, %v769_v32  ;;  %v771_v38 = vpop.f32.mrb[15].mxu0  ;;  %v899_v39 = vpop.f32.mrb[15].mxu1 }
 0x125   : > { %v1041_v37 = vmul.f32 %v2475_v20, %v897_v33 }
 0x126   : > { %v1077_v40 = vadd.f32 %v2477_v21, %v1009_v36  ;;  %v1140_v42 = vmax.f32 %v1076_v34, 0.0  ;;  %v1172_v43 = vmax.f32 %v1108_v35, 0.0 }
 0x127   : > { %v1109_v41 = vadd.f32 %v2477_v21, %v1041_v37 }
 0x128   : > { %v1141_v44 = vmax.f32 %v1077_v40, 0.0 }
 0x129   : > { %v1173_v45 = vmax.f32 %v1109_v41, 0.0  ;;  %v774_v46 = vpop.f32.mrb[16].mxu0  ;;  %v902_v47 = vpop.f32.mrb[16].mxu1 }
 0x12a   : > { %v1861_v48 = vpack.c.bf16 %v1141_v44, %v1140_v42  ;;  %v1010_v50 = vmul.f32 %v2475_v20, %v774_v46  ;;  %v1042_v51 = vmul.f32 %v2475_v20, %v902_v47  ;;  %v776_v52 = vpop.f32.mrb[17].mxu0  ;;  %v904_v53 = vpop.f32.mrb[17].mxu1 }
 0x12b   : > { %v1941_v49 = vpack.c.bf16 %v1173_v45, %v1172_v43  ;;  %v777_v54 = vpop.f32.mrb[18].mxu0  ;;  %v905_v55 = vpop.f32.mrb[18].mxu1 }
 0x12c   : > { %2005 = vst [vmem:[%s2492_s8 + $0x18] sm:$0xff] %v1861_v48   ;;  %v1078_v56 = vadd.f32 %v2477_v21, %v1010_v50  ;;  %v1110_v57 = vadd.f32 %v2477_v21, %v1042_v51  ;;  %v1011_v58 = vmul.f32 %v2475_v20, %v777_v54  ;;  %v1043_v59 = vmul.f32 %v2475_v20, %v905_v55  ;;  %v779_v60 = vpop.f32.mrb[19].mxu0  ;;  %v907_v61 = vpop.f32.mrb[19].mxu1 }
 0x12d   : > { %2021 = vst [vmem:[%s2492_s8 + $0x98] sm:$0xff] %v1941_v49  }
 0x12e   : > { %v1079_v62 = vadd.f32 %v2477_v21, %v1011_v58  ;;  %v1111_v63 = vadd.f32 %v2477_v21, %v1043_v59  ;;  %v1142_v0 = vmax.f32 %v1078_v56, 0.0  ;;  %v1174_v1 = vmax.f32 %v1110_v57, 0.0 }
 0x130   : > { %v1143_v2 = vmax.f32 %v1079_v62, 0.0  ;;  %v1175_v3 = vmax.f32 %v1111_v63, 0.0 }
 0x131   : > { %v782_v4 = vpop.f32.mrb[20].mxu0  ;;  %v910_v5 = vpop.f32.mrb[20].mxu1 }
 0x132   : > { %v1866_v6 = vpack.c.bf16 %v1143_v2, %v1142_v0  ;;  %v1946_v7 = vpack.c.bf16 %v1175_v3, %v1174_v1  ;;  %v1012_v8 = vmul.f32 %v2475_v20, %v782_v4  ;;  %v1044_v9 = vmul.f32 %v2475_v20, %v910_v5  ;;  %v784_v10 = vpop.f32.mrb[21].mxu0  ;;  %v912_v11 = vpop.f32.mrb[21].mxu1 }
 0x133   : > { %v785_v12 = vpop.f32.mrb[22].mxu0  ;;  %v913_v13 = vpop.f32.mrb[22].mxu1 }
 0x134   : > { %2006 = vst [vmem:[%s2492_s8 + $0x20] sm:$0xff] %v1866_v6   ;;  %2022 = vst [vmem:[%s2492_s8 + $0xa0] sm:$0xff] %v1946_v7   ;;  %v1080_v14 = vadd.f32 %v2477_v21, %v1012_v8  ;;  %v1112_v15 = vadd.f32 %v2477_v21, %v1044_v9  ;;  %v1013_v16 = vmul.f32 %v2475_v20, %v785_v12  ;;  %v787_v18 = vpop.f32.mrb[23].mxu0  ;;  %v915_v19 = vpop.f32.mrb[23].mxu1 }
 0x135   : > { %v1045_v17 = vmul.f32 %v2475_v20, %v913_v13 }
 0x136   : > { %v1081_v22 = vadd.f32 %v2477_v21, %v1013_v16  ;;  %v1144_v24 = vmax.f32 %v1080_v14, 0.0  ;;  %v1176_v25 = vmax.f32 %v1112_v15, 0.0 }
 0x137   : > { %v1113_v23 = vadd.f32 %v2477_v21, %v1045_v17 }
 0x138   : > { %v1145_v26 = vmax.f32 %v1081_v22, 0.0 }
 0x139   : > { %v1177_v27 = vmax.f32 %v1113_v23, 0.0  ;;  %v790_v28 = vpop.f32.mrb[24].mxu0  ;;  %v918_v29 = vpop.f32.mrb[24].mxu1 }
 0x13a   : > { %v1871_v30 = vpack.c.bf16 %v1145_v26, %v1144_v24  ;;  %v1014_v32 = vmul.f32 %v2475_v20, %v790_v28  ;;  %v1046_v33 = vmul.f32 %v2475_v20, %v918_v29  ;;  %v792_v34 = vpop.f32.mrb[25].mxu0  ;;  %v920_v35 = vpop.f32.mrb[25].mxu1 }
 0x13b   : > { %v1951_v31 = vpack.c.bf16 %v1177_v27, %v1176_v25  ;;  %v793_v36 = vpop.f32.mrb[26].mxu0  ;;  %v921_v37 = vpop.f32.mrb[26].mxu1 }
 0x13c   : > { %2007 = vst [vmem:[%s2492_s8 + $0x28] sm:$0xff] %v1871_v30   ;;  %v1082_v38 = vadd.f32 %v2477_v21, %v1014_v32  ;;  %v1114_v39 = vadd.f32 %v2477_v21, %v1046_v33  ;;  %v1015_v40 = vmul.f32 %v2475_v20, %v793_v36  ;;  %v1047_v41 = vmul.f32 %v2475_v20, %v921_v37  ;;  %v795_v42 = vpop.f32.mrb[27].mxu0  ;;  %v923_v43 = vpop.f32.mrb[27].mxu1 }
 0x13d   : > { %2023 = vst [vmem:[%s2492_s8 + $0xa8] sm:$0xff] %v1951_v31  }
 0x13e   : > { %v1083_v44 = vadd.f32 %v2477_v21, %v1015_v40  ;;  %v1115_v45 = vadd.f32 %v2477_v21, %v1047_v41  ;;  %v1146_v46 = vmax.f32 %v1082_v38, 0.0  ;;  %v1178_v47 = vmax.f32 %v1114_v39, 0.0 }
 0x140   : > { %v1147_v48 = vmax.f32 %v1083_v44, 0.0  ;;  %v1179_v49 = vmax.f32 %v1115_v45, 0.0 }
 0x141   : > { %v798_v50 = vpop.f32.mrb[28].mxu0  ;;  %v926_v51 = vpop.f32.mrb[28].mxu1 }
 0x142   : > { %v1876_v52 = vpack.c.bf16 %v1147_v48, %v1146_v46  ;;  %v1956_v53 = vpack.c.bf16 %v1179_v49, %v1178_v47  ;;  %v1016_v54 = vmul.f32 %v2475_v20, %v798_v50  ;;  %v1048_v55 = vmul.f32 %v2475_v20, %v926_v51  ;;  %v800_v56 = vpop.f32.mrb[29].mxu0  ;;  %v928_v57 = vpop.f32.mrb[29].mxu1 }
 0x143   : > { %v801_v58 = vpop.f32.mrb[30].mxu0  ;;  %v929_v59 = vpop.f32.mrb[30].mxu1 }
 0x144   : > { %2008 = vst [vmem:[%s2492_s8 + $0x30] sm:$0xff] %v1876_v52   ;;  %2024 = vst [vmem:[%s2492_s8 + $0xb0] sm:$0xff] %v1956_v53   ;;  %v1084_v60 = vadd.f32 %v2477_v21, %v1016_v54  ;;  %v1116_v61 = vadd.f32 %v2477_v21, %v1048_v55  ;;  %v1017_v62 = vmul.f32 %v2475_v20, %v801_v58  ;;  %v803_v0 = vpop.f32.mrb[31].mxu0  ;;  %v931_v1 = vpop.f32.mrb[31].mxu1 }
 0x145   : > { %v1049_v63 = vmul.f32 %v2475_v20, %v929_v59 }
 0x146   : > { %v1085_v2 = vadd.f32 %v2477_v21, %v1017_v62  ;;  %v1148_v4 = vmax.f32 %v1084_v60, 0.0  ;;  %v1180_v5 = vmax.f32 %v1116_v61, 0.0 }
 0x147   : > { %v1117_v3 = vadd.f32 %v2477_v21, %v1049_v63 }
 0x148   : > { %v1149_v6 = vmax.f32 %v1085_v2, 0.0 }
 0x149   : > { %v1181_v7 = vmax.f32 %v1117_v3, 0.0  ;;  %v806_v8 = vpop.f32.mrb[32].mxu0  ;;  %v934_v9 = vpop.f32.mrb[32].mxu1 }
 0x14a   : > { %v1881_v10 = vpack.c.bf16 %v1149_v6, %v1148_v4  ;;  %v1018_v12 = vmul.f32 %v2475_v20, %v806_v8  ;;  %v1050_v13 = vmul.f32 %v2475_v20, %v934_v9  ;;  %v808_v14 = vpop.f32.mrb[33].mxu0  ;;  %v936_v15 = vpop.f32.mrb[33].mxu1 }
 0x14b   : > { %v1961_v11 = vpack.c.bf16 %v1181_v7, %v1180_v5  ;;  %v809_v16 = vpop.f32.mrb[34].mxu0  ;;  %v937_v17 = vpop.f32.mrb[34].mxu1 }
 0x14c   : > { %2009 = vst [vmem:[%s2492_s8 + $0x38] sm:$0xff] %v1881_v10   ;;  %v1086_v18 = vadd.f32 %v2477_v21, %v1018_v12  ;;  %v1118_v19 = vadd.f32 %v2477_v21, %v1050_v13  ;;  %v1019_v22 = vmul.f32 %v2475_v20, %v809_v16  ;;  %v1051_v23 = vmul.f32 %v2475_v20, %v937_v17  ;;  %v811_v24 = vpop.f32.mrb[35].mxu0  ;;  %v939_v25 = vpop.f32.mrb[35].mxu1 }
 0x14d   : > { %2025 = vst [vmem:[%s2492_s8 + $0xb8] sm:$0xff] %v1961_v11  }
 0x14e   : > { %v1087_v26 = vadd.f32 %v2477_v21, %v1019_v22  ;;  %v1119_v27 = vadd.f32 %v2477_v21, %v1051_v23  ;;  %v1150_v28 = vmax.f32 %v1086_v18, 0.0  ;;  %v1182_v29 = vmax.f32 %v1118_v19, 0.0 }
 0x150   : > { %v1151_v30 = vmax.f32 %v1087_v26, 0.0  ;;  %v1183_v31 = vmax.f32 %v1119_v27, 0.0 }
 0x151   : > { %v814_v32 = vpop.f32.mrb[36].mxu0  ;;  %v942_v33 = vpop.f32.mrb[36].mxu1 }
 0x152   : > { %v1886_v34 = vpack.c.bf16 %v1151_v30, %v1150_v28  ;;  %v1966_v35 = vpack.c.bf16 %v1183_v31, %v1182_v29  ;;  %v1020_v36 = vmul.f32 %v2475_v20, %v814_v32  ;;  %v1052_v37 = vmul.f32 %v2475_v20, %v942_v33  ;;  %v816_v38 = vpop.f32.mrb[37].mxu0  ;;  %v944_v39 = vpop.f32.mrb[37].mxu1 }
 0x153   : > { %v817_v40 = vpop.f32.mrb[38].mxu0  ;;  %v945_v41 = vpop.f32.mrb[38].mxu1 }
 0x154   : > { %2010 = vst [vmem:[%s2492_s8 + $0x40] sm:$0xff] %v1886_v34   ;;  %2026 = vst [vmem:[%s2492_s8 + $0xc0] sm:$0xff] %v1966_v35   ;;  %v1088_v42 = vadd.f32 %v2477_v21, %v1020_v36  ;;  %v1120_v43 = vadd.f32 %v2477_v21, %v1052_v37  ;;  %v1021_v44 = vmul.f32 %v2475_v20, %v817_v40  ;;  %v819_v46 = vpop.f32.mrb[39].mxu0  ;;  %v947_v47 = vpop.f32.mrb[39].mxu1 }
 0x155   : > { %v1053_v45 = vmul.f32 %v2475_v20, %v945_v41 }
 0x156   : > { %v1089_v48 = vadd.f32 %v2477_v21, %v1021_v44  ;;  %v1152_v50 = vmax.f32 %v1088_v42, 0.0  ;;  %v1184_v51 = vmax.f32 %v1120_v43, 0.0 }
 0x157   : > { %v1121_v49 = vadd.f32 %v2477_v21, %v1053_v45 }
 0x158   : > { %v1153_v52 = vmax.f32 %v1089_v48, 0.0 }
 0x159   : > { %v1185_v53 = vmax.f32 %v1121_v49, 0.0  ;;  %v822_v54 = vpop.f32.mrb[40].mxu0  ;;  %v950_v55 = vpop.f32.mrb[40].mxu1 }
 0x15a   : > { %v1891_v56 = vpack.c.bf16 %v1153_v52, %v1152_v50  ;;  %v1022_v58 = vmul.f32 %v2475_v20, %v822_v54  ;;  %v1054_v59 = vmul.f32 %v2475_v20, %v950_v55  ;;  %v824_v60 = vpop.f32.mrb[41].mxu0  ;;  %v952_v61 = vpop.f32.mrb[41].mxu1 }
 0x15b   : > { %v1971_v57 = vpack.c.bf16 %v1185_v53, %v1184_v51  ;;  %v825_v62 = vpop.f32.mrb[42].mxu0  ;;  %v953_v63 = vpop.f32.mrb[42].mxu1 }
 0x15c   : > { %2011 = vst [vmem:[%s2492_s8 + $0x48] sm:$0xff] %v1891_v56   ;;  %v1090_v0 = vadd.f32 %v2477_v21, %v1022_v58  ;;  %v1122_v1 = vadd.f32 %v2477_v21, %v1054_v59  ;;  %v1023_v2 = vmul.f32 %v2475_v20, %v825_v62  ;;  %v1055_v3 = vmul.f32 %v2475_v20, %v953_v63  ;;  %v827_v4 = vpop.f32.mrb[43].mxu0  ;;  %v955_v5 = vpop.f32.mrb[43].mxu1 }
 0x15d   : > { %2027 = vst [vmem:[%s2492_s8 + $0xc8] sm:$0xff] %v1971_v57  }
 0x15e   : > { %v1091_v6 = vadd.f32 %v2477_v21, %v1023_v2  ;;  %v1123_v7 = vadd.f32 %v2477_v21, %v1055_v3  ;;  %v1154_v8 = vmax.f32 %v1090_v0, 0.0  ;;  %v1186_v9 = vmax.f32 %v1122_v1, 0.0 }
 0x160   : > { %v1155_v10 = vmax.f32 %v1091_v6, 0.0  ;;  %v1187_v11 = vmax.f32 %v1123_v7, 0.0 }
 0x161   : > { %v830_v12 = vpop.f32.mrb[44].mxu0  ;;  %v958_v13 = vpop.f32.mrb[44].mxu1 }
 0x162   : > { %v1896_v14 = vpack.c.bf16 %v1155_v10, %v1154_v8  ;;  %v1976_v15 = vpack.c.bf16 %v1187_v11, %v1186_v9  ;;  %v1024_v16 = vmul.f32 %v2475_v20, %v830_v12  ;;  %v1056_v17 = vmul.f32 %v2475_v20, %v958_v13  ;;  %v832_v18 = vpop.f32.mrb[45].mxu0  ;;  %v960_v19 = vpop.f32.mrb[45].mxu1 }
 0x163   : > { %v833_v22 = vpop.f32.mrb[46].mxu0  ;;  %v961_v23 = vpop.f32.mrb[46].mxu1 }
 0x164   : > { %2012 = vst [vmem:[%s2492_s8 + $0x50] sm:$0xff] %v1896_v14   ;;  %2028 = vst [vmem:[%s2492_s8 + $0xd0] sm:$0xff] %v1976_v15   ;;  %v1092_v24 = vadd.f32 %v2477_v21, %v1024_v16  ;;  %v1124_v25 = vadd.f32 %v2477_v21, %v1056_v17  ;;  %v1025_v26 = vmul.f32 %v2475_v20, %v833_v22  ;;  %v835_v28 = vpop.f32.mrb[47].mxu0  ;;  %v963_v29 = vpop.f32.mrb[47].mxu1 }
 0x165   : > { %v1057_v27 = vmul.f32 %v2475_v20, %v961_v23 }
 0x166   : > { %v1093_v30 = vadd.f32 %v2477_v21, %v1025_v26  ;;  %v1156_v32 = vmax.f32 %v1092_v24, 0.0  ;;  %v1188_v33 = vmax.f32 %v1124_v25, 0.0 }
 0x167   : > { %v1125_v31 = vadd.f32 %v2477_v21, %v1057_v27 }
 0x168   : > { %v1157_v34 = vmax.f32 %v1093_v30, 0.0 }
 0x169   : > { %v1189_v35 = vmax.f32 %v1125_v31, 0.0  ;;  %v838_v36 = vpop.f32.mrb[48].mxu0  ;;  %v966_v37 = vpop.f32.mrb[48].mxu1 }
 0x16a   : > { %v1901_v38 = vpack.c.bf16 %v1157_v34, %v1156_v32  ;;  %v1026_v40 = vmul.f32 %v2475_v20, %v838_v36  ;;  %v1058_v41 = vmul.f32 %v2475_v20, %v966_v37  ;;  %v840_v42 = vpop.f32.mrb[49].mxu0  ;;  %v968_v43 = vpop.f32.mrb[49].mxu1 }
 0x16b   : > { %v1981_v39 = vpack.c.bf16 %v1189_v35, %v1188_v33  ;;  %v841_v44 = vpop.f32.mrb[50].mxu0  ;;  %v969_v45 = vpop.f32.mrb[50].mxu1 }
 0x16c   : > { %2013 = vst [vmem:[%s2492_s8 + $0x58] sm:$0xff] %v1901_v38   ;;  %v1094_v46 = vadd.f32 %v2477_v21, %v1026_v40  ;;  %v1126_v47 = vadd.f32 %v2477_v21, %v1058_v41  ;;  %v1027_v48 = vmul.f32 %v2475_v20, %v841_v44  ;;  %v1059_v49 = vmul.f32 %v2475_v20, %v969_v45  ;;  %v843_v50 = vpop.f32.mrb[51].mxu0  ;;  %v971_v51 = vpop.f32.mrb[51].mxu1 }
 0x16d   : > { %2029 = vst [vmem:[%s2492_s8 + $0xd8] sm:$0xff] %v1981_v39  }
 0x16e   : > { %v1095_v52 = vadd.f32 %v2477_v21, %v1027_v48  ;;  %v1127_v53 = vadd.f32 %v2477_v21, %v1059_v49  ;;  %v1158_v54 = vmax.f32 %v1094_v46, 0.0  ;;  %v1190_v55 = vmax.f32 %v1126_v47, 0.0 }
 0x170   : > { %v1159_v56 = vmax.f32 %v1095_v52, 0.0  ;;  %v1191_v57 = vmax.f32 %v1127_v53, 0.0 }
 0x171   : > { %v846_v58 = vpop.f32.mrb[52].mxu0  ;;  %v974_v59 = vpop.f32.mrb[52].mxu1 }
 0x172   : > { %v1906_v60 = vpack.c.bf16 %v1159_v56, %v1158_v54  ;;  %v1986_v61 = vpack.c.bf16 %v1191_v57, %v1190_v55  ;;  %v1028_v62 = vmul.f32 %v2475_v20, %v846_v58  ;;  %v1060_v63 = vmul.f32 %v2475_v20, %v974_v59  ;;  %v848_v0 = vpop.f32.mrb[53].mxu0  ;;  %v976_v1 = vpop.f32.mrb[53].mxu1 }
 0x173   : > { %v849_v2 = vpop.f32.mrb[54].mxu0  ;;  %v977_v3 = vpop.f32.mrb[54].mxu1 }
 0x174   : > { %2014 = vst [vmem:[%s2492_s8 + $0x60] sm:$0xff] %v1906_v60   ;;  %2030 = vst [vmem:[%s2492_s8 + $0xe0] sm:$0xff] %v1986_v61   ;;  %v1096_v4 = vadd.f32 %v2477_v21, %v1028_v62  ;;  %v1128_v5 = vadd.f32 %v2477_v21, %v1060_v63  ;;  %v1029_v6 = vmul.f32 %v2475_v20, %v849_v2  ;;  %v851_v8 = vpop.f32.mrb[55].mxu0  ;;  %v979_v9 = vpop.f32.mrb[55].mxu1 }
 0x175   : > { %v1061_v7 = vmul.f32 %v2475_v20, %v977_v3 }
 0x176   : > { %v1097_v10 = vadd.f32 %v2477_v21, %v1029_v6  ;;  %v1160_v12 = vmax.f32 %v1096_v4, 0.0  ;;  %v1192_v13 = vmax.f32 %v1128_v5, 0.0 }
 0x177   : > { %v1129_v11 = vadd.f32 %v2477_v21, %v1061_v7 }
 0x178   : > { %v1161_v14 = vmax.f32 %v1097_v10, 0.0 }
 0x179   : > { %v1193_v15 = vmax.f32 %v1129_v11, 0.0  ;;  %v854_v16 = vpop.f32.mrb[56].mxu0  ;;  %v982_v17 = vpop.f32.mrb[56].mxu1 }
 0x17a   : > { %v1911_v18 = vpack.c.bf16 %v1161_v14, %v1160_v12  ;;  %v1030_v22 = vmul.f32 %v2475_v20, %v854_v16  ;;  %v1062_v23 = vmul.f32 %v2475_v20, %v982_v17  ;;  %v856_v24 = vpop.f32.mrb[57].mxu0  ;;  %v984_v25 = vpop.f32.mrb[57].mxu1 }
 0x17b   : > { %v1991_v19 = vpack.c.bf16 %v1193_v15, %v1192_v13  ;;  %v857_v26 = vpop.f32.mrb[58].mxu0  ;;  %v985_v27 = vpop.f32.mrb[58].mxu1 }
 0x17c   : > { %2015 = vst [vmem:[%s2492_s8 + $0x68] sm:$0xff] %v1911_v18   ;;  %v1098_v28 = vadd.f32 %v2477_v21, %v1030_v22  ;;  %v1130_v29 = vadd.f32 %v2477_v21, %v1062_v23  ;;  %v1031_v30 = vmul.f32 %v2475_v20, %v857_v26  ;;  %v1063_v31 = vmul.f32 %v2475_v20, %v985_v27  ;;  %v859_v32 = vpop.f32.mrb[59].mxu0  ;;  %v987_v33 = vpop.f32.mrb[59].mxu1 }
 0x17d   : > { %2031 = vst [vmem:[%s2492_s8 + $0xe8] sm:$0xff] %v1991_v19  }
 0x17e   : > { %v1099_v34 = vadd.f32 %v2477_v21, %v1031_v30  ;;  %v1131_v35 = vadd.f32 %v2477_v21, %v1063_v31  ;;  %v1162_v36 = vmax.f32 %v1098_v28, 0.0  ;;  %v1194_v37 = vmax.f32 %v1130_v29, 0.0 }
 0x180   : > { %v1163_v38 = vmax.f32 %v1099_v34, 0.0  ;;  %v1195_v39 = vmax.f32 %v1131_v35, 0.0 }
 0x181   : > { %v862_v40 = vpop.f32.mrb[60].mxu0  ;;  %v990_v41 = vpop.f32.mrb[60].mxu1 }
 0x182   : > { %v1916_v42 = vpack.c.bf16 %v1163_v38, %v1162_v36  ;;  %v1996_v43 = vpack.c.bf16 %v1195_v39, %v1194_v37  ;;  %v1032_v44 = vmul.f32 %v2475_v20, %v862_v40  ;;  %v1064_v45 = vmul.f32 %v2475_v20, %v990_v41  ;;  %v864_v46 = vpop.f32.mrb[61].mxu0  ;;  %v992_v47 = vpop.f32.mrb[61].mxu1 }
 0x183   : > { %v865_v48 = vpop.f32.mrb[62].mxu0  ;;  %v993_v49 = vpop.f32.mrb[62].mxu1 }
 0x184   : > { %2016 = vst [vmem:[%s2492_s8 + $0x70] sm:$0xff] %v1916_v42   ;;  %2032 = vst [vmem:[%s2492_s8 + $0xf0] sm:$0xff] %v1996_v43   ;;  %v1100_v50 = vadd.f32 %v2477_v21, %v1032_v44  ;;  %v1132_v51 = vadd.f32 %v2477_v21, %v1064_v45  ;;  %v1033_v52 = vmul.f32 %v2475_v20, %v865_v48  ;;  %v867_v54 = vpop.f32.mrb[63].mxu0  ;;  %v995_v55 = vpop.f32.mrb[63].mxu1 }
 0x185   : > { %v1065_v53 = vmul.f32 %v2475_v20, %v993_v49 }
 0x186   : > { %v1101_v56 = vadd.f32 %v2477_v21, %v1033_v52  ;;  %v1164_v58 = vmax.f32 %v1100_v50, 0.0  ;;  %v1196_v59 = vmax.f32 %v1132_v51, 0.0 }
 0x187   : > { %v1133_v57 = vadd.f32 %v2477_v21, %v1065_v53 }
 0x188   : > { %v1165_v60 = vmax.f32 %v1101_v56, 0.0 }
 0x189   : > { %v1197_v61 = vmax.f32 %v1133_v57, 0.0 }
 0x18a   : > { %v1921_v20 = vpack.c.bf16 %v1165_v60, %v1164_v58 }
 0x18b   : > { %v2001_v62 = vpack.c.bf16 %v1197_v61, %v1196_v59 }
 0x18c   : > { %2017 = vst [vmem:[%s2492_s8 + $0x78] sm:$0xff] %v1921_v20  }
 0x18d   : > { %2033 = vst [vmem:[%s2492_s8 + $0xf8] sm:$0xff] %v2001_v62  }
 0x18e   : > { %2216 = shalt.err (!%p2213_p3)
}
 0x18f   : > { %s2217_s27 = scalar_lea.hbm %s2647_s19, 4096  ;;  %s2221_s30 = scalar_lea.hbm %s2699_s3, 8192 }
 0x190   : > { %p2218_p4 = scmp.ne.s32.totalorder %s2647_s19, %s2217_s27  ;;  %p2222_p9 = scmp.lt.u32.totalorder %s2647_s19, %s2699_s3 }
 0x191   : > { %p2223_p10 = scmp.lt.u32.totalorder %s2221_s30, %s2217_s27  ;;  %p2225_p12 = scmp.lt.u32.totalorder %s2217_s27, %s2647_s19 }
 0x192   : > { %p2219_p7 = pnand %p2218_p4, %p2330_p5 }
 0x193   : > { %p2224_p11 = por %p2223_p10, %p2222_p9 }
 0x194   : > { %p2220_p8 = pneg %p2219_p7 }
 0x195   : > { %p2226_p13 = por %p2225_p12, %p2224_p11 }
 0x197   : > { %p2227_p0 = pnand %p2226_p13, %p2220_p8 }
 0x199   : > { %2230 = shalt.err (!%p2227_p0)
}
 0x19a   : > { %s2270_s6 = smov 64   ;;  %s2271_s7 = smov 4  }
 0x19b   : > { %2054 = dma.vmem_to_hbm [thread:$0]  (%p2330_p5), %s2649_s10, 4096, %s2647_s19, %s2655_s16, %s2270_s6, %s2270_s6, %s2271_s7  }
 0x19c PF: > { %p2060_p1 = scmp.ge.s32.totalorder %s2265_s15, 2  ;;  %s1547_s8 = sand.u32 1, %s2253_s12  }
 0x19d   : > { %s1548_s9 = scalar_lea.sflag [#allocation3], %s1547_s8 }
 0x19e   : > { %p2057_p2 = pnand %p2060_p1, %p2334_p6 }
 0x1a0   : > { %2248 = dma.done.wait (!%p2057_p2), %s1548_s9, 4096  }
 0x1a1   : > { %2250 = vsyncadd (!%p2057_p2), %s1548_s9, 4294963200  ;;  %p13_p3 = scmp.ge.s32.totalorder %s2317_s18, 4   ;;  %s2702_s12 = smov %s2257_s13 }
 0x1a2   : > { %s2703_s13 = smov %s2261_s14  ;;  %s2704_s14 = smov %s2328_s21 }
 0x1a3   : > { %s2705_s15 = smov %s2317_s18  ;;  %15 = sbr.rel (!%p13_p3) target bundleno = 3 (0x3), region = 67 }
 0x1aa   :  { %1553 = vsyncpa [#allocation3], 1 }
 0x1ab   :  { %1555 = vsyncpa [#allocation3 + $0x1], 1 }

</bundles_post_ra>
